<compile_context>
chip_gen: v7x
topology: tpu7x:2x2x1
jax: 0.10.0
libtpu: 0.0.40
codegen_flags: <defaults>
</compile_context>

<pallas_src>
import math

import jax
import jax.numpy as jnp
from jax.experimental import pallas as pl
from jax.experimental.pallas import tpu as pltpu

HIDDEN = 128   # fixed by the torch module
LANE = 128     # TPU lane width


def _round_up(n, m):
    return ((n + m - 1) // m) * m


# ----------------------------------------------------------------------------
# Kernel: fused actor+critic MLP on one batch tile.
# ----------------------------------------------------------------------------
def _policy_kernel(x_ref, w1_ref, b1_ref, w2_ref, b2_ref, w3_ref, b3_ref, out_ref):
    # Layer 1: [TB, S_pad] @ [S_pad, 2H]   (actor hidden || critic hidden)
    h = jnp.tanh(
        jnp.dot(x_ref[...], w1_ref[...], preferred_element_type=jnp.float32)
        + b1_ref[...]
    )
    # Layer 2: [TB, 2H] @ [2H, 2H] block-diagonal
    h = jnp.tanh(
        jnp.dot(h, w2_ref[...], preferred_element_type=jnp.float32) + b2_ref[...]
    )
    # Layer 3: [TB, 2H] @ [2H, 128] -> lane-dense output slab
    # (lanes 0..A-1 = action_mean, lane A = value, rest = 0)
    out_ref[...] = (
        jnp.dot(h, w3_ref[...], preferred_element_type=jnp.float32) + b3_ref[...]
    )


# ----------------------------------------------------------------------------
# Parameter init (torch-equivalent layout: W stored as [in, out]).
# ----------------------------------------------------------------------------
def xavier_normal(key, fan_in, fan_out, gain):
    std = gain * math.sqrt(2.0 / (fan_in + fan_out))
    return std * jax.random.normal(key, (fan_in, fan_out), dtype=jnp.float32)


def init_policy_params(key, state_space, action_space, hidden=HIDDEN):
    gain = 5.0 / 3.0  # torch.nn.init.calculate_gain('tanh')
    keys = jax.random.split(key, 6)
    return {
        # Actor
        "w1a": xavier_normal(keys[0], state_space, hidden, gain),
        "b1a": jnp.zeros((1, hidden), jnp.float32),
        "w2a": xavier_normal(keys[1], hidden, hidden, gain),
        "b2a": jnp.zeros((1, hidden), jnp.float32),
        "w3a": xavier_normal(keys[2], hidden, action_space, gain),
        "b3a": jnp.zeros((1, action_space), jnp.float32),
        # sigma parameter (pre-softplus), init 0.5 as in the module
        "sigma": jnp.full((action_space,), 0.5, jnp.float32),
        # Critic
        "w1c": xavier_normal(keys[3], state_space, hidden, gain),
        "b1c": jnp.zeros((1, hidden), jnp.float32),
        "w2c": xavier_normal(keys[4], hidden, hidden, gain),
        "b2c": jnp.zeros((1, hidden), jnp.float32),
        "w3c": xavier_normal(keys[5], hidden, 1, gain),
        "b3c": jnp.zeros((1, 1), jnp.float32),
    }


def fuse_policy_params(p):
    """Host-side one-time fusion of actor+critic weights for the kernel."""
    S, H = p["w1a"].shape
    A = p["w3a"].shape[1]
    s_pad = _round_up(max(S, 8), LANE)       # pad contraction dim to lane width
    out_w = _round_up(A + 1, LANE)           # lane-dense output slab width

    # Layer 1: x is shared -> concat along output columns, zero-pad extra rows.
    w1 = jnp.zeros((s_pad, 2 * H), jnp.float32)
    w1 = w1.at[:S, :H].set(p["w1a"]).at[:S, H:].set(p["w1c"])
    b1 = jnp.concatenate([p["b1a"], p["b1c"]], axis=1)          # [1, 2H]

    # Layer 2: block-diagonal.
    w2 = jnp.zeros((2 * H, 2 * H), jnp.float32)
    w2 = w2.at[:H, :H].set(p["w2a"]).at[H:, H:].set(p["w2c"])
    b2 = jnp.concatenate([p["b2a"], p["b2c"]], axis=1)          # [1, 2H]

    # Layer 3: block-diagonal + lane padding.
    w3 = jnp.zeros((2 * H, out_w), jnp.float32)
    w3 = w3.at[:H, :A].set(p["w3a"]).at[H:, A:A + 1].set(p["w3c"])
    b3 = jnp.zeros((1, out_w), jnp.float32)
    b3 = b3.at[:, :A].set(p["b3a"]).at[:, A:A + 1].set(p["b3c"])

    return {
        "w1": w1, "b1": b1, "w2": w2, "b2": b2, "w3": w3, "b3": b3,
        "sigma": p["sigma"],
        "state_space": S, "action_space": A,
        "s_pad": s_pad, "out_w": out_w, "h2": 2 * H,
    }


# ----------------------------------------------------------------------------
# Wrapper
# ----------------------------------------------------------------------------
def policy_forward(x, fused, *, batch_tile=256):
    """Full Policy.forward. Returns (action_mean [B,A], sigma [A], value [B,1])."""
    B, S = x.shape
    A = fused["action_space"]
    s_pad, out_w, h2 = fused["s_pad"], fused["out_w"], fused["h2"]

    # Batch tile: multiple of 8 (f32 sublane); pad B up to a whole grid.
    tb = min(batch_tile, _round_up(B, 8))
    b_pad = _round_up(B, tb)

    # Zero-pad state dim to lane width and batch to the tile grid.
    x_pad = jnp.zeros((b_pad, s_pad), jnp.float32)
    x_pad = x_pad.at[:B, :S].set(x.astype(jnp.float32))

    const = lambda i: (0, 0)  # weights stay resident in VMEM across the grid
    out = pl.pallas_call(
        _policy_kernel,
        out_shape=jax.ShapeDtypeStruct((b_pad, out_w), jnp.float32),
        grid=(b_pad // tb,),
        in_specs=[
            pl.BlockSpec((tb, s_pad), lambda i: (i, 0)),   # x tile
            pl.BlockSpec((s_pad, h2), const),              # W1
            pl.BlockSpec((1, h2), const),                  # b1
            pl.BlockSpec((h2, h2), const),                 # W2
            pl.BlockSpec((1, h2), const),                  # b2
            pl.BlockSpec((h2, out_w), const),              # W3
            pl.BlockSpec((1, out_w), const),               # b3
        ],
        out_specs=pl.BlockSpec((tb, out_w), lambda i: (i, 0)),
        compiler_params=pltpu.CompilerParams(
            dimension_semantics=("parallel",),
            vmem_limit_bytes=32 * 1024 * 1024,  # explicit budget; safe on v7x 64 MiB
        ),
    )(x_pad, fused["w1"], fused["b1"], fused["w2"], fused["b2"],
      fused["w3"], fused["b3"])

    action_mean = out[:B, :A]
    value = out[:B, A:A + 1]
    # softplus(sigma) is x-independent: hoisted out of the kernel.
    # jax.nn.softplus is numerically stable (matches torch F.softplus threshold behavior).
    sigma = jax.nn.softplus(fused["sigma"])
    # TODO(synk): Normal(action_mean, sigma) distribution object has no Pallas
    # equivalent; (action_mean, sigma) fully parameterize it and are returned.
    return action_mean, sigma, value


# ----------------------------------------------------------------------------
# Pure-JAX reference (unfused), for sanity checking.
# ----------------------------------------------------------------------------
def policy_forward_ref(x, p):
    ha = jnp.tanh(x @ p["w1a"] + p["b1a"])
    ha = jnp.tanh(ha @ p["w2a"] + p["b2a"])
    mean = ha @ p["w3a"] + p["b3a"]
    sigma = jax.nn.softplus(p["sigma"])
    hc = jnp.tanh(x @ p["w1c"] + p["b1c"])
    hc = jnp.tanh(hc @ p["w2c"] + p["b2c"])
    value = hc @ p["w3c"] + p["b3c"]
    return mean, sigma, value


if __name__ == "__main__":
    key = jax.random.PRNGKey(0)
    k_params, k_x = jax.random.split(key)

    state_space = 8
    action_space = 4
    batch = 8

    params = init_policy_params(k_params, state_space, action_space)
    fused = fuse_policy_params(params)
    x = jax.random.normal(k_x, (batch, state_space), dtype=jnp.float32)

    mean, sigma, value = policy_forward(x, fused)
    jax.block_until_ready((mean, sigma, value))

    mean_r, sigma_r, value_r = policy_forward_ref(x, params)
    assert jnp.allclose(mean, mean_r, atol=1e-5, rtol=1e-5)
    assert jnp.allclose(sigma, sigma_r, atol=1e-6, rtol=1e-6)
    assert jnp.allclose(value, value_r, atol=1e-5, rtol=1e-5)

    print("KERNEL_OK")
</pallas_src>

<mosaic_0001>
module attributes {stable_mosaic.version = 11 : i64} {
  func.func @_policy_kernel(%arg0: i32, %arg1: memref<8x128xf32, #tpu.memory_space<vmem>>, %arg2: memref<128x256xf32, #tpu.memory_space<vmem>>, %arg3: memref<1x256xf32, #tpu.memory_space<vmem>>, %arg4: memref<256x256xf32, #tpu.memory_space<vmem>>, %arg5: memref<1x256xf32, #tpu.memory_space<vmem>>, %arg6: memref<256x128xf32, #tpu.memory_space<vmem>>, %arg7: memref<1x128xf32, #tpu.memory_space<vmem>>, %arg8: memref<8x128xf32, #tpu.memory_space<vmem>>) attributes {dimension_semantics = [#tpu.dimension_semantics<parallel>], iteration_bounds = array<i64: 1>, scalar_prefetch = 0 : i64, scratch_operands = 0 : i64, tpu.core_type = #tpu.core_type<tc>, window_params = [{transform_indices = @transform_0, window_bounds = array<i64: 8, 128>}, {pipeline_mode = #tpu.pipeline_mode<synchronous>, transform_indices = @transform_1, window_bounds = array<i64: 128, 256>}, {pipeline_mode = #tpu.pipeline_mode<synchronous>, transform_indices = @transform_2, window_bounds = array<i64: 1, 256>}, {pipeline_mode = #tpu.pipeline_mode<synchronous>, transform_indices = @transform_3, window_bounds = array<i64: 256, 256>}, {pipeline_mode = #tpu.pipeline_mode<synchronous>, transform_indices = @transform_4, window_bounds = array<i64: 1, 256>}, {pipeline_mode = #tpu.pipeline_mode<synchronous>, transform_indices = @transform_5, window_bounds = array<i64: 256, 128>}, {pipeline_mode = #tpu.pipeline_mode<synchronous>, transform_indices = @transform_6, window_bounds = array<i64: 1, 128>}, {transform_indices = @transform_7, window_bounds = array<i64: 8, 128>}]} {
    %c0 = arith.constant 0 : index
    %c0_0 = arith.constant 0 : index
    %0 = vector.load %arg1[%c0, %c0_0] : memref<8x128xf32, #tpu.memory_space<vmem>>, vector<8x128xf32>
    %c0_1 = arith.constant 0 : index
    %c0_2 = arith.constant 0 : index
    %1 = vector.load %arg2[%c0_1, %c0_2] : memref<128x256xf32, #tpu.memory_space<vmem>>, vector<128x256xf32>
    %cst = arith.constant dense<0.000000e+00> : vector<8x256xf32>
    %2 = tpu.matmul %0, %1, %cst {dimension_numbers = #tpu.dot_dimension_numbers<[1], [0], [0], [1], [0, 0, 1, 1], [], []>} : vector<8x128xf32>, vector<128x256xf32>, vector<8x256xf32> -> vector<8x256xf32>
    %c0_3 = arith.constant 0 : index
    %c0_4 = arith.constant 0 : index
    %3 = vector.load %arg3[%c0_3, %c0_4] : memref<1x256xf32, #tpu.memory_space<vmem>>, vector<1x256xf32>
    %4 = vector.broadcast %3 : vector<1x256xf32> to vector<8x256xf32>
    %5 = arith.addf %2, %4 : vector<8x256xf32>
    %6 = math.tanh %5 : vector<8x256xf32>
    %c0_5 = arith.constant 0 : index
    %c0_6 = arith.constant 0 : index
    %7 = vector.load %arg4[%c0_5, %c0_6] : memref<256x256xf32, #tpu.memory_space<vmem>>, vector<256x256xf32>
    %cst_7 = arith.constant dense<0.000000e+00> : vector<8x256xf32>
    %8 = tpu.matmul %6, %7, %cst_7 {dimension_numbers = #tpu.dot_dimension_numbers<[1], [0], [0], [1], [0, 0, 1, 1], [], []>} : vector<8x256xf32>, vector<256x256xf32>, vector<8x256xf32> -> vector<8x256xf32>
    %c0_8 = arith.constant 0 : index
    %c0_9 = arith.constant 0 : index
    %9 = vector.load %arg5[%c0_8, %c0_9] : memref<1x256xf32, #tpu.memory_space<vmem>>, vector<1x256xf32>
    %10 = vector.broadcast %9 : vector<1x256xf32> to vector<8x256xf32>
    %11 = arith.addf %8, %10 : vector<8x256xf32>
    %12 = math.tanh %11 : vector<8x256xf32>
    %c0_10 = arith.constant 0 : index
    %c0_11 = arith.constant 0 : index
    %13 = vector.load %arg6[%c0_10, %c0_11] : memref<256x128xf32, #tpu.memory_space<vmem>>, vector<256x128xf32>
    %cst_12 = arith.constant dense<0.000000e+00> : vector<8x128xf32>
    %14 = tpu.matmul %12, %13, %cst_12 {dimension_numbers = #tpu.dot_dimension_numbers<[1], [0], [0], [1], [0, 0, 1, 1], [], []>} : vector<8x256xf32>, vector<256x128xf32>, vector<8x128xf32> -> vector<8x128xf32>
    %c0_13 = arith.constant 0 : index
    %c0_14 = arith.constant 0 : index
    %15 = vector.load %arg7[%c0_13, %c0_14] : memref<1x128xf32, #tpu.memory_space<vmem>>, vector<1x128xf32>
    %16 = vector.broadcast %15 : vector<1x128xf32> to vector<8x128xf32>
    %17 = arith.addf %14, %16 : vector<8x128xf32>
    %c0_15 = arith.constant 0 : index
    %c0_16 = arith.constant 0 : index
    %18 = vector.load %arg8[%c0_15, %c0_16] : memref<8x128xf32, #tpu.memory_space<vmem>>, vector<8x128xf32>
    tpu.vector_store %arg8[%c0_15, %c0_16], %17 {strides = array<i32>} : memref<8x128xf32, #tpu.memory_space<vmem>>, vector<8x128xf32>,
    return
  }
  func.func @transform_0(%arg0: i32) -> (i32, i32) {
    %c0_i32 = arith.constant 0 : i32
    %c0_i32_0 = arith.constant 0 : i32
    return %arg0, %c0_i32 : i32, i32
  }
  func.func @transform_1(%arg0: i32) -> (i32, i32) {
    %c0_i32 = arith.constant 0 : i32
    %c0_i32_0 = arith.constant 0 : i32
    %c0_i32_1 = arith.constant 0 : i32
    return %c0_i32, %c0_i32_0 : i32, i32
  }
  func.func @transform_2(%arg0: i32) -> (i32, i32) {
    %c0_i32 = arith.constant 0 : i32
    %c0_i32_0 = arith.constant 0 : i32
    %c0_i32_1 = arith.constant 0 : i32
    return %c0_i32, %c0_i32_0 : i32, i32
  }
  func.func @transform_3(%arg0: i32) -> (i32, i32) {
    %c0_i32 = arith.constant 0 : i32
    %c0_i32_0 = arith.constant 0 : i32
    %c0_i32_1 = arith.constant 0 : i32
    return %c0_i32, %c0_i32_0 : i32, i32
  }
  func.func @transform_4(%arg0: i32) -> (i32, i32) {
    %c0_i32 = arith.constant 0 : i32
    %c0_i32_0 = arith.constant 0 : i32
    %c0_i32_1 = arith.constant 0 : i32
    return %c0_i32, %c0_i32_0 : i32, i32
  }
  func.func @transform_5(%arg0: i32) -> (i32, i32) {
    %c0_i32 = arith.constant 0 : i32
    %c0_i32_0 = arith.constant 0 : i32
    %c0_i32_1 = arith.constant 0 : i32
    return %c0_i32, %c0_i32_0 : i32, i32
  }
  func.func @transform_6(%arg0: i32) -> (i32, i32) {
    %c0_i32 = arith.constant 0 : i32
    %c0_i32_0 = arith.constant 0 : i32
    %c0_i32_1 = arith.constant 0 : i32
    return %c0_i32, %c0_i32_0 : i32, i32
  }
  func.func @transform_7(%arg0: i32) -> (i32, i32) {
    %c0_i32 = arith.constant 0 : i32
    %c0_i32_0 = arith.constant 0 : i32
    return %arg0, %c0_i32 : i32, i32
  }
}

</mosaic_0001>

<bundles_post_ra>
// kernel: tpu_custom_call.1
= control target key start
LH: loop header
LB: loop body
LE: loop exit
PB: predicated region body
PF: predicated region fallthrough
CT: control target
= control target key end

     0   :  { %12 = vsyncpa [#allocation3], 0  ;;  %s899_s0 = inlined_call_operand.hbm [shape: f32[8,128], index: 0, kind: input, shape index: {}]   ;;  %s900_s1 = inlined_call_operand.hbm [shape: f32[128,256], index: 1, kind: input, shape index: {}]   ;;  %s901_s2 = inlined_call_operand.vmem [shape: f32[1,256], index: 2, kind: input, shape index: {}]   ;;  %s902_s3 = inlined_call_operand.hbm [shape: f32[256,256], index: 3, kind: input, shape index: {}]   ;;  %s903_s4 = inlined_call_operand.vmem [shape: f32[1,256], index: 4, kind: input, shape index: {}]   ;;  %s904_s5 = inlined_call_operand.hbm [shape: f32[256,128], index: 5, kind: input, shape index: {}]   ;;  %s905_s6 = inlined_call_operand.vmem [shape: f32[1,128], index: 6, kind: input, shape index: {}]   ;;  %s906_s7 = inlined_call_operand.hbm [shape: f32[8,128], index: 7, kind: output, shape index: {}]  }
   0x1   :  { %13 = vsyncpa [#allocation6], 0 }
   0x2   :  { %14 = vsyncpa [#allocation9], 0 }
   0x3   :  { %15 = vsyncpa [#allocation4], 0  ;;  %s774_s24 = smov [#allocation5]   ;;  %s656_s28 = scalar_lea.hbm %s900_s1, 4096 }
   0x4   :  { %s31_s25 = sshll.u32 %s774_s24, 4  ;;  %p657_p0 = scmp.ne.s32.totalorder %s900_s1, %s656_s28  ;;  %s32_s25 = int_to_ptr.vmem [resolvable:$true] %s31_s25 }
   0x5   :  { %p660_p1 = scmp.lt.u32.totalorder %s656_s28, %s900_s1 }
   0x7   :  { %p662_p2 = pnand %p660_p1, %p657_p0 }
   0x9   :  { %665 = shalt.err (!%p662_p2)
}
   0xa   :  { %s666_s10 = scalar_lea.vmem %s32_s25, 4096  ;;  %p671_p4 = scmp.lt.s32.totalorder %s32_s25, %s32_s25 }
   0xb   :  { %p667_p3 = scmp.ne.s32.totalorder %s32_s25, %s666_s10  ;;  %p672_p5 = scmp.lt.s32.totalorder %s666_s10, %s666_s10 }
   0xd   :  { %p673_p6 = por %p672_p5, %p671_p4 }
   0xf   :  { %p674_p7 = pnand %p673_p6, %p667_p3 }
  0x11   :  { %677 = shalt.err (!%p674_p7)
}
  0x12   :  { %s775_s11 = smov 256   ;;  %s776_s12 = smov 16  }
  0x13   :  { %37 = dma.hbm_to_vmem [thread:$0]  %s900_s1, 4096, %s32_s25, [#allocation6], %s775_s11, %s775_s11, %s776_s12  }
  0x14   :  { %s777_s15 = smov [#allocation2]   ;;  %s778_s17 = smov [#allocation7]  }
  0x15   :  { %s22_s16 = sshll.u32 %s777_s15, 4  ;;  %s45_s18 = sshll.u32 %s778_s17, 4  ;;  %s23_s16 = int_to_ptr.vmem [resolvable:$true] %s22_s16  ;;  %s46_s18 = int_to_ptr.vmem [resolvable:$true] %s45_s18 }
  0x16   :  { %s678_s21 = scalar_lea.hbm %s899_s0, 128 }
  0x17   :  { %p679_p8 = scmp.ne.s32.totalorder %s899_s0, %s678_s21  ;;  %p682_p9 = scmp.lt.u32.totalorder %s678_s21, %s899_s0 }
  0x19   :  { %p684_p10 = pnand %p682_p9, %p679_p8 }
  0x1b   :  { %687 = shalt.err (!%p684_p10)
}
  0x1c   :  { %s688_s1 = scalar_lea.vmem %s23_s16, 128  ;;  %p693_p12 = scmp.lt.s32.totalorder %s23_s16, %s23_s16 }
  0x1d   :  { %p689_p11 = scmp.ne.s32.totalorder %s23_s16, %s688_s1  ;;  %p694_p13 = scmp.lt.s32.totalorder %s688_s1, %s688_s1 }
  0x1f   :  { %p695_p0 = por %p694_p13, %p693_p12 }
  0x21   :  { %p696_p1 = pnand %p695_p0, %p689_p11 }
  0x23   :  { %699 = shalt.err (!%p696_p1)
}
  0x24   :  { %25 = dma.hbm_to_vmem [thread:$0]  %s899_s0, 128, %s23_s16, [#allocation3]  }
  0x25   :  { %s700_s30 = scalar_lea.hbm %s902_s3, 8192 }
  0x26   :  { %p701_p2 = scmp.ne.s32.totalorder %s902_s3, %s700_s30  ;;  %p704_p3 = scmp.lt.u32.totalorder %s700_s30, %s902_s3 }
  0x28   :  { %p706_p4 = pnand %p704_p3, %p701_p2 }
  0x2a   :  { %709 = shalt.err (!%p706_p4)
}
  0x2b   :  { %s710_s14 = scalar_lea.vmem %s46_s18, 8192  ;;  %p715_p6 = scmp.lt.s32.totalorder %s46_s18, %s46_s18 }
  0x2c   :  { %p711_p5 = scmp.ne.s32.totalorder %s46_s18, %s710_s14  ;;  %p716_p7 = scmp.lt.s32.totalorder %s710_s14, %s710_s14 }
  0x2e   :  { %p717_p8 = por %p716_p7, %p715_p6 }
  0x30   :  { %p718_p9 = pnand %p717_p8, %p711_p5 }
  0x32   :  { %721 = shalt.err (!%p718_p9)
}
  0x33   :  { %51 = dma.hbm_to_vmem [thread:$0]  %s902_s3, 8192, %s46_s18, [#allocation6], %s775_s11, %s775_s11, %s776_s12  }
  0x34   :  { %s779_s16 = smov [#allocation8]   ;;  %s722_s21 = scalar_lea.hbm %s904_s5, 4096 }
  0x35   :  { %s59_s17 = sshll.u32 %s779_s16, 4  ;;  %p723_p10 = scmp.ne.s32.totalorder %s904_s5, %s722_s21  ;;  %s60_s17 = int_to_ptr.vmem [resolvable:$true] %s59_s17 }
  0x36   :  { %p726_p11 = scmp.lt.u32.totalorder %s722_s21, %s904_s5 }
  0x38   :  { %p728_p12 = pnand %p726_p11, %p723_p10 }
  0x3a   :  { %731 = shalt.err (!%p728_p12)
}
  0x3b   :  { %s732_s1 = scalar_lea.vmem %s60_s17, 4096  ;;  %p737_p0 = scmp.lt.s32.totalorder %s60_s17, %s60_s17 }
  0x3c   :  { %p733_p13 = scmp.ne.s32.totalorder %s60_s17, %s732_s1  ;;  %p738_p1 = scmp.lt.s32.totalorder %s732_s1, %s732_s1 }
  0x3e   :  { %p739_p2 = por %p738_p1, %p737_p0 }
  0x40   :  { %p740_p3 = pnand %p739_p2, %p733_p13 }
  0x42   :  { %743 = shalt.err (!%p740_p3)
}
  0x43   :  { %s780_s3 = smov 128   ;;  %s781_s11 = smov 8  }
  0x44   :  { %65 = dma.hbm_to_vmem [thread:$0]  %s904_s5, 4096, %s60_s17, [#allocation9], %s780_s3, %s780_s3, %s781_s11  }
  0x45   :  { %766 = dma.done.wait [#allocation3], 128  }
  0x46   :  { %767 = vsyncadd [#allocation3], 4294967168 }
  0x47   :  { %768 = dma.done.wait [#allocation6], 12288  }
  0x48   :  { %769 = vsyncadd [#allocation6], 4294955008 }
  0x49   :  { %770 = dma.done.wait [#allocation9], 4096  }
  0x4a   :  { %771 = vsyncadd [#allocation9], 4294963200  ;;  %v782_v0 = vmov 0.0   ;;  %v82_v1 = vld [vmem:[#allocation5 + $0x8] sm:$0xff]  ;;  %v84_v2 = vld [vmem:[#allocation5 + $0x18] sm:$0xff]  ;;  %s783_s30 = smov [#allocation10]  }
  0x4b   :  { %189 = vmatprep.mubr.f32.mxu0 %v782_v0  ;;  %v81_v3 = vld [vmem:[#allocation5] sm:$0xff]  ;;  %v510_v4 = vpack.c.bf16 %v84_v2, %v82_v1  ;;  %v83_v5 = vld [vmem:[#allocation5 + $0x10] sm:$0xff]  ;;  %v86_v6 = vld [vmem:[#allocation5 + $0x28] sm:$0xff] }
  0x4c   :  { %v88_v7 = vld [vmem:[#allocation5 + $0x38] sm:$0xff]  ;;  %v512_v8 = vpack.c.bf16 %v83_v5, %v81_v3  ;;  %v85_v10 = vld [vmem:[#allocation5 + $0x20] sm:$0xff]  ;;  %v87_v11 = vld [vmem:[#allocation5 + $0x30] sm:$0xff] }
  0x4d   :  { %v514_v9 = vpack.c.bf16 %v88_v7, %v86_v6  ;;  %v90_v12 = vld [vmem:[#allocation5 + $0x48] sm:$0xff]  ;;  %511 = vmatprep.subr.bf16.mxu0 %v510_v4  ;;  %v92_v13 = vld [vmem:[#allocation5 + $0x58] sm:$0xff]  ;;  %v516_v14 = vpack.c.bf16 %v87_v11, %v85_v10  ;;  %v89_v16 = vld [vmem:[#allocation5 + $0x40] sm:$0xff] }
  0x4e   :  { %513 = vmatpush1.bf16.msra.mxu0 %v512_v8  ;;  %v518_v15 = vpack.c.bf16 %v92_v13, %v90_v12  ;;  %v91_v17 = vld [vmem:[#allocation5 + $0x50] sm:$0xff]  ;;  %v94_v18 = vld [vmem:[#allocation5 + $0x68] sm:$0xff]  ;;  %v96_v19 = vld [vmem:[#allocation5 + $0x78] sm:$0xff] }
  0x4f   :  { %515 = vmatprep.subr.bf16.mxu0 %v514_v9  ;;  %v520_v20 = vpack.c.bf16 %v91_v17, %v89_v16  ;;  %v522_v21 = vpack.c.bf16 %v96_v19, %v94_v18  ;;  %v93_v22 = vld [vmem:[#allocation5 + $0x60] sm:$0xff]  ;;  %v95_v23 = vld [vmem:[#allocation5 + $0x70] sm:$0xff]  ;;  %v98_v24 = vld [vmem:[#allocation5 + $0x88] sm:$0xff] }
  0x50   :  { %v100_v25 = vld [vmem:[#allocation5 + $0x98] sm:$0xff]  ;;  %v97_v26 = vld [vmem:[#allocation5 + $0x80] sm:$0xff]  ;;  %v99_v27 = vld [vmem:[#allocation5 + $0x90] sm:$0xff]  ;;  %v524_v31 = vpack.c.bf16 %v95_v23, %v93_v22 }
  0x51   :  { %v199_v28 = vld [vmem:[#allocation7 + $0x8] sm:$0xff]  ;;  %v201_v29 = vld [vmem:[#allocation7 + $0x18] sm:$0xff]  ;;  %v198_v30 = vld [vmem:[#allocation7] sm:$0xff]  ;;  %v526_v36 = vpack.c.bf16 %v100_v25, %v98_v24  ;;  %v528_v46 = vpack.c.bf16 %v99_v27, %v97_v26 }
  0x52   :  { %517 = vmatpush1.bf16.msra.mxu0 %v516_v14  ;;  %v542_v32 = vpack.c.bf16 %v201_v29, %v199_v28  ;;  %v200_v33 = vld [vmem:[#allocation7 + $0x10] sm:$0xff]  ;;  %v203_v34 = vld [vmem:[#allocation7 + $0x28] sm:$0xff]  ;;  %v205_v35 = vld [vmem:[#allocation7 + $0x38] sm:$0xff] }
  0x53   :  { %519 = vmatprep.subr.bf16.mxu0 %v518_v15  ;;  %v544_v37 = vpack.c.bf16 %v200_v33, %v198_v30  ;;  %v546_v38 = vpack.c.bf16 %v205_v35, %v203_v34  ;;  %v202_v39 = vld [vmem:[#allocation7 + $0x20] sm:$0xff]  ;;  %v204_v40 = vld [vmem:[#allocation7 + $0x30] sm:$0xff]  ;;  %v207_v41 = vld [vmem:[#allocation7 + $0x48] sm:$0xff] }
  0x54   :  { %v102_v42 = vld [vmem:[#allocation5 + $0xa8] sm:$0xff]  ;;  %v104_v43 = vld [vmem:[#allocation5 + $0xb8] sm:$0xff]  ;;  %543 = vmatprep.subr.bf16.mxu1 %v542_v32  ;;  %v548_v45 = vpack.c.bf16 %v204_v40, %v202_v39  ;;  %v101_v47 = vld [vmem:[#allocation5 + $0xa0] sm:$0xff] }
  0x55   :  { %v209_v44 = vld [vmem:[#allocation7 + $0x58] sm:$0xff]  ;;  %545 = vmatpush1.bf16.msra.mxu1 %v544_v37  ;;  %v206_v49 = vld [vmem:[#allocation7 + $0x40] sm:$0xff]  ;;  %v208_v50 = vld [vmem:[#allocation7 + $0x50] sm:$0xff]  ;;  %v530_v51 = vpack.c.bf16 %v104_v43, %v102_v42 }
  0x56   :  { %521 = vmatpush1.bf16.msra.mxu0 %v520_v20  ;;  %547 = vmatprep.subr.bf16.mxu1 %v546_v38  ;;  %v550_v48 = vpack.c.bf16 %v209_v44, %v207_v41  ;;  %v103_v52 = vld [vmem:[#allocation5 + $0xb0] sm:$0xff]  ;;  %v211_v53 = vld [vmem:[#allocation7 + $0x68] sm:$0xff]  ;;  %v213_v54 = vld [vmem:[#allocation7 + $0x78] sm:$0xff]  ;;  %v552_v57 = vpack.c.bf16 %v208_v50, %v206_v49 }
  0x57   :  { %523 = vmatprep.subr.bf16.mxu0 %v522_v21  ;;  %v106_v55 = vld [vmem:[#allocation5 + $0xc8] sm:$0xff]  ;;  %v108_v56 = vld [vmem:[#allocation5 + $0xd8] sm:$0xff]  ;;  %v532_v58 = vpack.c.bf16 %v103_v52, %v101_v47  ;;  %v105_v59 = vld [vmem:[#allocation5 + $0xc0] sm:$0xff]  ;;  %v554_v60 = vpack.c.bf16 %v213_v54, %v211_v53 }
  0x58   :  { %v210_v61 = vld [vmem:[#allocation7 + $0x60] sm:$0xff]  ;;  %v212_v62 = vld [vmem:[#allocation7 + $0x70] sm:$0xff]  ;;  %v534_v63 = vpack.c.bf16 %v108_v56, %v106_v55  ;;  %v215_v1 = vld [vmem:[#allocation7 + $0x88] sm:$0xff] }
  0x59   :  { %549 = vmatpush1.bf16.msra.mxu1 %v548_v45  ;;  %v107_v0 = vld [vmem:[#allocation5 + $0xd0] sm:$0xff]  ;;  %v217_v2 = vld [vmem:[#allocation7 + $0x98] sm:$0xff]  ;;  %v110_v3 = vld [vmem:[#allocation5 + $0xe8] sm:$0xff]  ;;  %v556_v5 = vpack.c.bf16 %v212_v62, %v210_v61 }
  0x5a   :  { %525 = vmatpush1.bf16.msra.mxu0 %v524_v31  ;;  %551 = vmatprep.subr.bf16.mxu1 %v550_v48  ;;  %v112_v4 = vld [vmem:[#allocation5 + $0xf8] sm:$0xff]  ;;  %v536_v6 = vpack.c.bf16 %v107_v0, %v105_v59  ;;  %v109_v7 = vld [vmem:[#allocation5 + $0xe0] sm:$0xff]  ;;  %v558_v8 = vpack.c.bf16 %v217_v2, %v215_v1  ;;  %v216_v10 = vld [vmem:[#allocation7 + $0x90] sm:$0xff] }
  0x5b   :  { %527 = vmatprep.subr.bf16.mxu0 %v526_v36  ;;  %v214_v9 = vld [vmem:[#allocation7 + $0x80] sm:$0xff]  ;;  %v538_v11 = vpack.c.bf16 %v112_v4, %v110_v3  ;;  %v111_v12 = vld [vmem:[#allocation5 + $0xf0] sm:$0xff]  ;;  %v219_v13 = vld [vmem:[#allocation7 + $0xa8] sm:$0xff] }
  0x5c   :  { %v221_v14 = vld [vmem:[#allocation7 + $0xb8] sm:$0xff]  ;;  %v560_v15 = vpack.c.bf16 %v216_v10, %v214_v9  ;;  %v540_v16 = vpack.c.bf16 %v111_v12, %v109_v7  ;;  %v218_v18 = vld [vmem:[#allocation7 + $0xa0] sm:$0xff]  ;;  %v220_v19 = vld [vmem:[#allocation7 + $0xb0] sm:$0xff] }
  0x5d   :  { %553 = vmatpush1.bf16.msra.mxu1 %v552_v57  ;;  %v562_v17 = vpack.c.bf16 %v221_v14, %v219_v13  ;;  %v223_v20 = vld [vmem:[#allocation7 + $0xc8] sm:$0xff]  ;;  %v225_v21 = vld [vmem:[#allocation7 + $0xd8] sm:$0xff]  ;;  %v564_v22 = vpack.c.bf16 %v220_v19, %v218_v18  ;;  %v222_v25 = vld [vmem:[#allocation7 + $0xc0] sm:$0xff] }
  0x5e   :  { %529 = vmatpush1.bf16.msra.mxu0 %v528_v46  ;;  %555 = vmatprep.subr.bf16.mxu1 %v554_v60  ;;  %v80_v23 = vld [vmem:[#allocation2] sm:$0xff]  ;;  %v566_v24 = vpack.c.bf16 %v225_v21, %v223_v20  ;;  %v224_v26 = vld [vmem:[#allocation7 + $0xd0] sm:$0xff]  ;;  %v227_v27 = vld [vmem:[#allocation7 + $0xe8] sm:$0xff] }
  0x5f   :  { %531 = vmatprep.subr.bf16.mxu0 %v530_v51  ;;  %v229_v28 = vld [vmem:[#allocation7 + $0xf8] sm:$0xff]  ;;  %v568_v29 = vpack.c.bf16 %v224_v26, %v222_v25  ;;  %v226_v31 = vld [vmem:[#allocation7 + $0xe0] sm:$0xff]  ;;  %v228_v32 = vld [vmem:[#allocation7 + $0xf0] sm:$0xff] }
  0x60   :  { %v570_v30 = vpack.c.bf16 %v229_v28, %v227_v27  ;;  %v231_v33 = vld [vmem:[#allocation7 + $0x108] sm:$0xff]  ;;  %v233_v34 = vld [vmem:[#allocation7 + $0x118] sm:$0xff]  ;;  %v572_v35 = vpack.c.bf16 %v228_v32, %v226_v31  ;;  %v230_v37 = vld [vmem:[#allocation7 + $0x100] sm:$0xff] }
  0x61   :  { %557 = vmatpush1.bf16.msra.mxu1 %v556_v5  ;;  %v574_v36 = vpack.c.bf16 %v233_v34, %v231_v33  ;;  %v232_v38 = vld [vmem:[#allocation7 + $0x110] sm:$0xff]  ;;  %v235_v39 = vld [vmem:[#allocation7 + $0x128] sm:$0xff]  ;;  %v237_v40 = vld [vmem:[#allocation7 + $0x138] sm:$0xff] }
  0x62   :  { %533 = vmatpush1.bf16.msra.mxu0 %v532_v58  ;;  %559 = vmatprep.subr.bf16.mxu1 %v558_v8  ;;  %v576_v41 = vpack.c.bf16 %v232_v38, %v230_v37  ;;  %v578_v42 = vpack.c.bf16 %v237_v40, %v235_v39  ;;  %v234_v43 = vld [vmem:[#allocation7 + $0x120] sm:$0xff]  ;;  %v236_v44 = vld [vmem:[#allocation7 + $0x130] sm:$0xff]  ;;  %v239_v45 = vld [vmem:[#allocation7 + $0x148] sm:$0xff] }
  0x63   :  { %535 = vmatprep.subr.bf16.mxu0 %v534_v63  ;;  %v241_v46 = vld [vmem:[#allocation7 + $0x158] sm:$0xff]  ;;  %v580_v47 = vpack.c.bf16 %v236_v44, %v234_v43  ;;  %v238_v49 = vld [vmem:[#allocation7 + $0x140] sm:$0xff]  ;;  %v240_v50 = vld [vmem:[#allocation7 + $0x150] sm:$0xff] }
  0x64   :  { %v582_v48 = vpack.c.bf16 %v241_v46, %v239_v45  ;;  %v243_v51 = vld [vmem:[#allocation7 + $0x168] sm:$0xff]  ;;  %v245_v52 = vld [vmem:[#allocation7 + $0x178] sm:$0xff]  ;;  %v584_v53 = vpack.c.bf16 %v240_v50, %v238_v49  ;;  %v242_v55 = vld [vmem:[#allocation7 + $0x160] sm:$0xff] }
  0x65   :  { %561 = vmatpush1.bf16.msra.mxu1 %v560_v15  ;;  %v586_v54 = vpack.c.bf16 %v245_v52, %v243_v51  ;;  %v244_v56 = vld [vmem:[#allocation7 + $0x170] sm:$0xff]  ;;  %v247_v58 = vld [vmem:[#allocation7 + $0x188] sm:$0xff]  ;;  %v249_v59 = vld [vmem:[#allocation7 + $0x198] sm:$0xff] }
  0x66   :  { %537 = vmatpush1.bf16.msra.mxu0 %v536_v6  ;;  %563 = vmatprep.subr.bf16.mxu1 %v562_v17  ;;  %v588_v57 = vpack.c.bf16 %v244_v56, %v242_v55  ;;  %v590_v60 = vpack.c.bf16 %v249_v59, %v247_v58  ;;  %v246_v61 = vld [vmem:[#allocation7 + $0x180] sm:$0xff]  ;;  %v248_v62 = vld [vmem:[#allocation7 + $0x190] sm:$0xff]  ;;  %v251_v0 = vld [vmem:[#allocation7 + $0x1a8] sm:$0xff] }
  0x67   :  { %539 = vmatprep.subr.bf16.mxu0 %v538_v11  ;;  %v592_v63 = vpack.c.bf16 %v248_v62, %v246_v61  ;;  %v253_v1 = vld [vmem:[#allocation7 + $0x1b8] sm:$0xff]  ;;  %v250_v3 = vld [vmem:[#allocation7 + $0x1a0] sm:$0xff]  ;;  %v252_v4 = vld [vmem:[#allocation7 + $0x1b0] sm:$0xff] }
  0x68   :  { %v594_v2 = vpack.c.bf16 %v253_v1, %v251_v0  ;;  %v596_v5 = vpack.c.bf16 %v252_v4, %v250_v3  ;;  %v255_v6 = vld [vmem:[#allocation7 + $0x1c8] sm:$0xff]  ;;  %v257_v7 = vld [vmem:[#allocation7 + $0x1d8] sm:$0xff]  ;;  %v254_v8 = vld [vmem:[#allocation7 + $0x1c0] sm:$0xff] }
  0x69   :  { %565 = vmatpush1.bf16.msra.mxu1 %v564_v22  ;;  %v598_v9 = vpack.c.bf16 %v257_v7, %v255_v6  ;;  %v256_v10 = vld [vmem:[#allocation7 + $0x1d0] sm:$0xff]  ;;  %v259_v11 = vld [vmem:[#allocation7 + $0x1e8] sm:$0xff]  ;;  %v261_v12 = vld [vmem:[#allocation7 + $0x1f8] sm:$0xff] }
  0x6a   :  { %541 = vmatpush1.bf16.msra.mxu0 %v540_v16  ;;  %567 = vmatprep.subr.bf16.mxu1 %v566_v24  ;;  %v600_v13 = vpack.c.bf16 %v256_v10, %v254_v8  ;;  %v602_v14 = vpack.c.bf16 %v261_v12, %v259_v11  ;;  %v258_v15 = vld [vmem:[#allocation7 + $0x1e0] sm:$0xff]  ;;  %v260_v16 = vld [vmem:[#allocation7 + $0x1f0] sm:$0xff]  ;;  %v364_v19 = vld [vmem:[#allocation8 + $0x88] sm:$0xff] }
  0x6b   :  { %v604_v17 = vpack.c.bf16 %v260_v16, %v258_v15  ;;  %v363_v18 = vld [vmem:[#allocation8 + $0x80] sm:$0xff]  ;;  %v348_v22 = vld [vmem:[#allocation8 + $0x8] sm:$0xff]  ;;  %v366_v24 = vld [vmem:[#allocation8 + $0x98] sm:$0xff] }
  0x6c   :  { %v347_v20 = vld [vmem:[#allocation8] sm:$0xff]  ;;  %v606_v21 = vpack.c.bf16 %v364_v19, %v363_v18  ;;  %v349_v27 = vld [vmem:[#allocation8 + $0x10] sm:$0xff]  ;;  %v350_v28 = vld [vmem:[#allocation8 + $0x18] sm:$0xff] }
  0x6d   :  { %190 = vmatmul.mubr.f32.vlgmr.msra.gmra.mrb[0].mxu0 %v80_v23  ;;  %569 = vmatpush1.bf16.msra.mxu1 %v568_v29  ;;  %v365_v23 = vld [vmem:[#allocation8 + $0x90] sm:$0xff]  ;;  %v608_v25 = vpack.c.bf16 %v348_v22, %v347_v20  ;;  %v367_v29 = vld [vmem:[#allocation8 + $0xa0] sm:$0xff]  ;;  %v612_v31 = vpack.c.bf16 %v350_v28, %v349_v27  ;;  %v352_v34 = vld [vmem:[#allocation8 + $0x28] sm:$0xff] }
  0x6e   :  { %571 = vmatprep.subr.bf16.mxu1 %v570_v30  ;;  %v610_v26 = vpack.c.bf16 %v366_v24, %v365_v23  ;;  %607 = vmatprep.subr.bf16.mxu0 %v606_v21  ;;  %v368_v30 = vld [vmem:[#allocation8 + $0xa8] sm:$0xff]  ;;  %v351_v33 = vld [vmem:[#allocation8 + $0x20] sm:$0xff]  ;;  %v353_v39 = vld [vmem:[#allocation8 + $0x30] sm:$0xff] }
  0x6f   :  { %609 = vmatpush3.bf16.msra.mxu0 %v608_v25  ;;  %v614_v32 = vpack.c.bf16 %v368_v30, %v367_v29  ;;  %v616_v37 = vpack.c.bf16 %v352_v34, %v351_v33  ;;  %v354_v40 = vld [vmem:[#allocation8 + $0x38] sm:$0xff]  ;;  %v371_v55 = vld [vmem:[#allocation8 + $0xc0] sm:$0xff]  ;;  %v372_v56 = vld [vmem:[#allocation8 + $0xc8] sm:$0xff] }
  0x70   :  { %611 = vmatprep.subr.bf16.mxu0 %v610_v26  ;;  %v113_v45 = vld [vmem:[%s901_s2] sm:$0x3]  ;;  %v355_v58 = vld [vmem:[#allocation8 + $0x40] sm:$0xff]  ;;  %v356_v59 = vld [vmem:[#allocation8 + $0x48] sm:$0xff] }
  0x71   :  { %573 = vmatpush1.bf16.msra.mxu1 %v572_v35  ;;  %v369_v35 = vld [vmem:[#allocation8 + $0xb0] sm:$0xff]  ;;  %v374_v62 = vld [vmem:[#allocation8 + $0xd8] sm:$0xff]  ;;  %v375_v3 = vld [vmem:[#allocation8 + $0xe0] sm:$0xff] }
  0x72   :  { %575 = vmatprep.subr.bf16.mxu1 %v574_v36  ;;  %v370_v36 = vld [vmem:[#allocation8 + $0xb8] sm:$0xff]  ;;  %v373_v61 = vld [vmem:[#allocation8 + $0xd0] sm:$0xff]  ;;  %v376_v4 = vld [vmem:[#allocation8 + $0xe8] sm:$0xff] }
  0x73   :  { %613 = vmatpush3.bf16.msra.mxu0 %v612_v31  ;;  %v618_v38 = vpack.c.bf16 %v370_v36, %v369_v35  ;;  %v357_v0 = vld [vmem:[#allocation8 + $0x50] sm:$0xff]  ;;  %v358_v1 = vld [vmem:[#allocation8 + $0x58] sm:$0xff]  ;;  %v630_v6 = vpack.c.bf16 %v376_v4, %v375_v3  ;;  %v360_v7 = vld [vmem:[#allocation8 + $0x68] sm:$0xff] }
  0x74   :  { %615 = vmatprep.subr.bf16.mxu0 %v614_v32  ;;  %v377_v8 = vld [vmem:[#allocation8 + $0xf0] sm:$0xff]  ;;  %v262_v15 = vld [vmem:[%s903_s4] sm:$0x3]  ;;  %s463_s4 = sshll.u32 %s783_s30, 4  ;;  %s464_s4 = int_to_ptr.vmem [resolvable:$true] %s463_s4 }
  0x75   :  { %577 = vmatpush1.bf16.msra.mxu1 %v576_v41  ;;  %v620_v41 = vpack.c.bf16 %v354_v40, %v353_v39  ;;  %v361_v12 = vld [vmem:[#allocation8 + $0x70] sm:$0xff]  ;;  %v474_v25 = vld [vmem:[%s905_s6] ss:$0 sm:$0xff]  ;;  %s744_s8 = scalar_lea.vmem %s464_s4, 128  ;;  %p749_p5 = scmp.lt.s32.totalorder %s464_s4, %s464_s4 }
  0x76   :  { %579 = vmatprep.subr.bf16.mxu1 %v578_v42  ;;  %v115_v42 = vlaneseq  ;;  %p745_p4 = scmp.ne.s32.totalorder %s464_s4, %s744_s8  ;;  %p750_p6 = scmp.lt.s32.totalorder %s744_s8, %s744_s8 }
  0x77   :  { %617 = vmatpush3.bf16.msra.mxu0 %v616_v37 }
  0x78   :  { %619 = vmatprep.subr.bf16.mxu0 %v618_v38  ;;  %v116_v43 = vshrl.u32 %v115_v42, 7  ;;  %p751_p7 = por %p750_p6, %p749_p5 }
  0x79   :  { %581 = vmatpush1.bf16.msra.mxu1 %v580_v47 }
  0x7a   :  { %583 = vmatprep.subr.bf16.mxu1 %v582_v48  ;;  %v117_v44 = vsub.s32 0, %v116_v43  ;;  %v121_v46 = vsub.s32 1, %v116_v43  ;;  %p752_p8 = pnand %p751_p7, %p745_p4 }
  0x7b   :  { %621 = vmatpush3.bf16.msra.mxu0 %v620_v41 }
  0x7c   :  { %v118_v47 = vrot.slane %v113_v45, %v117_v44  ;;  %v122_v48 = vrot.slane %v113_v45, %v121_v46  ;;  %v267_v16 = vrot.slane %v262_v15, %v117_v44 }
  0x7d   :  { %585 = vmatpush1.bf16.msra.mxu1 %v584_v53 }
  0x7e   :  { %587 = vmatprep.subr.bf16.mxu1 %v586_v54 }
  0x81   :  { %589 = vmatpush1.bf16.msra.mxu1 %v588_v57  ;;  %v622_v57 = vpack.c.bf16 %v372_v56, %v371_v55 }
  0x82   :  { %591 = vmatprep.subr.bf16.mxu1 %v590_v60  ;;  %v624_v60 = vpack.c.bf16 %v356_v59, %v355_v58 }
  0x83   :  { %623 = vmatprep.subr.bf16.mxu0 %v622_v57 }
  0x84   :  { %625 = vmatpush3.bf16.msra.mxu0 %v624_v60 }
  0x85   :  { %593 = vmatpush1.bf16.msra.mxu1 %v592_v63  ;;  %v626_v63 = vpack.c.bf16 %v374_v62, %v373_v61 }
  0x86   :  { %595 = vmatprep.subr.bf16.mxu1 %v594_v2  ;;  %v628_v2 = vpack.c.bf16 %v358_v1, %v357_v0 }
  0x87   :  { %627 = vmatprep.subr.bf16.mxu0 %v626_v63 }
  0x88   :  { %629 = vmatpush3.bf16.msra.mxu0 %v628_v2 }
  0x89   :  { %597 = vmatpush1.bf16.msra.mxu1 %v596_v5  ;;  %v359_v5 = vld [vmem:[#allocation8 + $0x60] sm:$0xff]  ;;  %631 = vmatprep.subr.bf16.mxu0 %v630_v6 }
  0x8a   :  { %599 = vmatprep.subr.bf16.mxu1 %v598_v9  ;;  %v378_v9 = vld [vmem:[#allocation8 + $0xf8] sm:$0xff]  ;;  %v632_v10 = vpack.c.bf16 %v360_v7, %v359_v5 }
  0x8b   :  { %v634_v11 = vpack.c.bf16 %v378_v9, %v377_v8 }
  0x8c   :  { %633 = vmatpush3.bf16.msra.mxu0 %v632_v10 }
  0x8d   :  { %601 = vmatpush1.bf16.msra.mxu1 %v600_v13  ;;  %v362_v13 = vld [vmem:[#allocation8 + $0x78] sm:$0xff]  ;;  %635 = vmatprep.subr.bf16.mxu0 %v634_v11 }
  0x8e   :  { %603 = vmatprep.subr.bf16.mxu1 %v602_v14  ;;  %v636_v14 = vpack.c.bf16 %v362_v13, %v361_v12 }
  0x90   :  { %637 = vmatpush3.bf16.msra.mxu0 %v636_v14 }
  0x91   :  { %605 = vmatpush1.bf16.msra.mxu1 %v604_v17  ;;  %v271_v17 = vrot.slane %v262_v15, %v121_v46 }
 0x140   :  { %v191_v49 = vpop.f32.mrb[0].mxu0 }
 0x141   :  { %v192_v50 = vadd.f32 %v191_v49, %v118_v47  ;;  %v193_v51 = vpop.f32.mrb[1].mxu0 }
 0x142   :  { %v194_v52 = vadd.f32 %v193_v51, %v122_v48 }
 0x144   :  { %648 = vtanh.f32 %v194_v52 }
 0x145   :  { %650 = vtanh.f32 %v192_v50 }
 0x14e   :  { %v649_v53 = vpop.eup %648 }
 0x14f   :  { %v651_v54 = vpop.eup %650  ;;  %338 = vmatprep.mubr.f32.mxu1 %v649_v53 }
 0x150   :  { %339 = vmatmul.mubr.f32.vlgmr.msra.gmra.mrb[0].mxu1 %v651_v54 }
 0x223   :  { %v340_v18 = vpop.f32.mrb[0].mxu1 }
 0x224   :  { %v341_v19 = vadd.f32 %v340_v18, %v267_v16  ;;  %v342_v20 = vpop.f32.mrb[1].mxu1 }
 0x225   :  { %v343_v21 = vadd.f32 %v342_v20, %v271_v17 }
 0x227   :  { %652 = vtanh.f32 %v343_v21 }
 0x228   :  { %654 = vtanh.f32 %v341_v19 }
 0x231   :  { %v653_v22 = vpop.eup %652 }
 0x232   :  { %v655_v23 = vpop.eup %654  ;;  %450 = vmatprep.mubr.f32.mxu0 %v653_v22 }
 0x233   :  { %451 = vmatmul.mubr.f32.vlgmr.msra.gmra.mrb[2].mxu0 %v655_v23 }
 0x306   :  { %v507_v24 = vpop.f32.mrb[2].mxu0 }
 0x307   :  { %v508_v26 = vpop.f32.mrb[3].mxu0 }
 0x308   :  { %v509_v27 = vadd.f32 %v508_v26, %v507_v24 }
 0x30a   :  { %v453_v28 = vadd.f32 %v509_v27, %v474_v25 }
 0x30c   :  { %456 = vst [vmem:[#allocation10] sm:$0xff] %v453_v28 }
 0x30d   :  { %755 = shalt.err (!%p752_p8)
}
 0x30e   :  { %s756_s13 = scalar_lea.hbm %s906_s7, 128 }
 0x30f   :  { %p757_p9 = scmp.ne.s32.totalorder %s906_s7, %s756_s13  ;;  %p760_p10 = scmp.lt.u32.totalorder %s756_s13, %s906_s7 }
 0x311   :  { %p762_p11 = pnand %p760_p10, %p757_p9 }
 0x313   :  { %765 = shalt.err (!%p762_p11)
}
 0x314   :  { %466 = dma.vmem_to_hbm [thread:$0]  %s464_s4, 128, %s906_s7, [#allocation4]  }
 0x315   :  { %772 = dma.done.wait [#allocation4], 128  }
 0x316   :  { %773 = vsyncadd [#allocation4], 4294967168 }
 0x317   :  { %470 = vsyncpa [#allocation3], 1 }
 0x318   :  { %471 = vsyncpa [#allocation6], 1 }
 0x319   :  { %472 = vsyncpa [#allocation9], 1 }
 0x31a   :  { %473 = vsyncpa [#allocation4], 1 }

</bundles_post_ra>
